<compile_context>
chip_gen: v7x
topology: tpu7x:2x2x1
jax: 0.10.0
libtpu: 0.0.40
codegen_flags: <defaults>
</compile_context>

<pallas_src>
import jax
import jax.numpy as jnp
from jax.experimental import pallas as pl
from jax.experimental.pallas import tpu as pltpu

EPS = 1e-5
INPUT_DIM = 18
WEIGHT_DTYPE = jnp.bfloat16   # bf16 storage + native bf16 MXU feed (f32 acc)

# ---- packed bf16 weight slab layout (256 lanes wide, row offsets 8-aligned) --
_W1_OFF, _W1_ROWS = 0, INPUT_DIM           # w1: (18, 256)       rows [0, 18)
_W2_OFF, _W2_ROWS = 24, 256                # w2: (256, 128)      rows [24, 280)
_W3_OFF, _W3_ROWS = _W2_OFF + 256, 128     # w3: (128, 128) pad  rows [280, 408)
_W4_OFF, _W4_ROWS = _W3_OFF + 128, 128     # w4: (128, 128) pad  rows [408, 536)
_W_SLAB_ROWS = _W4_OFF + 128               # 536 rows total (~140 KiB bf16 used)


def _linear_bn_silu(h, w, gamma, beta, inv_b):
    """Linear (bias dropped: cancels under training-mode BN) -> BN -> SiLU."""
    # bf16 operands straight into the MXU (native on v5e/v6e/v7x), f32 acc.
    z = jnp.dot(h.astype(w.dtype), w, preferred_element_type=jnp.float32)

    # Two-pass (centered) batch statistics: biased variance, no E[z^2]-mean^2
    # cancellation on unstandardized inputs.
    mean = jnp.sum(z, axis=0, keepdims=True) * inv_b
    c = z - mean
    var = jnp.sum(c * c, axis=0, keepdims=True) * inv_b

    scale = gamma * jax.lax.rsqrt(var + EPS)   # rsqrt -> EUP (free slot)
    zbn = c * scale + beta                     # folded BN affine: one FMA
    return zbn * jax.nn.sigmoid(zbn)           # SiLU (dropout p=0 is a no-op)


def mlp_kernel(x_ref, w_ref, p_ref, o_ref):
    inv_b = 1.0 / x_ref.shape[0]               # static chunk size -> Python float
    h = x_ref[...]                              # (chunk, 18) f32

    # Layer 1: 18 -> 256
    h = _linear_bn_silu(h, w_ref[_W1_OFF:_W1_OFF + _W1_ROWS, :],
                        p_ref[0:1, :], p_ref[1:2, :], inv_b)
    # Layer 2: 256 -> 128
    h = _linear_bn_silu(h, w_ref[_W2_OFF:_W2_OFF + _W2_ROWS, 0:128],
                        p_ref[2:3, 0:128], p_ref[2:3, 128:256], inv_b)
    # Layer 3: 128 -> 64 (cols 64.. are zero-padded; gamma/beta pad = 0 keeps
    # padded activations exactly 0 through BN and SiLU)
    h = _linear_bn_silu(h, w_ref[_W3_OFF:_W3_OFF + _W3_ROWS, 0:128],
                        p_ref[3:4, 0:128], p_ref[3:4, 128:256], inv_b)
    # Layer 4: 64 -> 32 (same padding scheme; lanes >=32 of h are exactly 0)
    h = _linear_bn_silu(h, w_ref[_W4_OFF:_W4_OFF + _W4_ROWS, 0:128],
                        p_ref[4:5, 0:128], p_ref[4:5, 128:256], inv_b)

    # Final Linear 32 -> 1 on the VPU + XLU lane reduce (an MXU matmul with
    # N=1 would waste the whole result path).  Pad lanes of h and w5 are 0.
    w5 = p_ref[5:6, 0:128]                      # (1, 128) f32, lanes >=32 zero
    b5 = p_ref[5:6, 128:129]                    # (1, 1) f32
    o_ref[...] = jnp.sum(h * w5, axis=-1, keepdims=True) + b5


def init_params(key, input_dim=INPUT_DIM):
    """Fresh f32 params matching the PyTorch module.

    Linear: kaiming_normal_(nonlinearity='relu') => std=sqrt(2/fan_in), bias=0
    (hidden biases omitted: zero at init and cancelled by training-mode BN).
    BatchNorm1d: gamma=1, beta=0.
    Returns [w1,g1,be1, w2,g2,be2, w3,g3,be3, w4,g4,be4, w5_row, b5].
    """
    dims = [input_dim, 256, 128, 64, 32, 1]
    params = []
    keys = jax.random.split(key, 5)
    for i in range(5):
        fan_in, fan_out = dims[i], dims[i + 1]
        std = (2.0 / fan_in) ** 0.5
        w = jax.random.normal(keys[i], (fan_in, fan_out), jnp.float32) * std
        if i < 4:
            params += [w,
                       jnp.ones((1, fan_out), jnp.float32),    # gamma
                       jnp.zeros((1, fan_out), jnp.float32)]   # beta
        else:
            params += [w.T,                                    # (1, 32) head row
                       jnp.zeros((1, 1), jnp.float32)]         # output bias b5
    return params


def pack_params(params, weight_dtype=WEIGHT_DTYPE):
    """Pack 14 arrays into two slabs: bf16 weights (536,256), f32 small (8,256)."""
    (w1, g1, be1, w2, g2, be2, w3, g3, be3, w4, g4, be4, w5_row, b5) = params

    def blk(w, rows):
        r, c = w.shape
        return jnp.pad(w, ((0, rows - r), (0, 256 - c)))

    w_slab = jnp.concatenate([
        blk(w1, _W2_OFF - _W1_OFF),            # rows 18..23 zero (never read)
        blk(w2, _W3_OFF - _W2_OFF),            # lanes 128..255 zero
        blk(w3, _W4_OFF - _W3_OFF),            # lanes 64..255 zero
        blk(w4, _W_SLAB_ROWS - _W4_OFF),       # rows 64..127 & lanes 32..255 zero
    ], axis=0).astype(weight_dtype)

    def half(v):
        v = v.reshape(1, -1)
        return jnp.pad(v, ((0, 0), (0, 128 - v.shape[1])))

    p_slab = jnp.concatenate([
        g1.reshape(1, 256),                                          # row 0
        be1.reshape(1, 256),                                         # row 1
        jnp.concatenate([half(g2), half(be2)], axis=1),              # row 2
        jnp.concatenate([half(g3), half(be3)], axis=1),              # row 3
        jnp.concatenate([half(g4), half(be4)], axis=1),              # row 4
        jnp.concatenate([half(w5_row),
                         jnp.broadcast_to(b5.reshape(1, 1), (1, 128))], axis=1),
        jnp.zeros((2, 256), jnp.float32),                            # rows 6-7 pad
    ], axis=0)                                                       # (8, 256) f32
    return w_slab, p_slab


def improved_heart_disease_forward(x, w_slab, p_slab, chunk_b=None):
    """Forward pass.  Each `chunk_b`-row chunk of x is an independent BatchNorm
    batch (training-mode statistics); default = the whole batch is one chunk."""
    B = x.shape[0]
    if chunk_b is None:
        chunk_b = B
    assert B % chunk_b == 0, (B, chunk_b)
    num_chunks = B // chunk_b
    assert num_chunks == 1 or chunk_b % 8 == 0, chunk_b   # sublane alignment

    return pl.pallas_call(
        mlp_kernel,
        out_shape=jax.ShapeDtypeStruct((B, 1), jnp.float32),
        grid=(num_chunks,),
        in_specs=[
            # per-chunk activations
            pl.BlockSpec((chunk_b, INPUT_DIM), lambda i: (i, 0)),
            # packed weights / BN+head params: constant block index -> DMA'd
            # once per call, VMEM-resident across all chunks.
            pl.BlockSpec(w_slab.shape, lambda i: (0, 0)),
            pl.BlockSpec(p_slab.shape, lambda i: (0, 0)),
        ],
        out_specs=pl.BlockSpec((chunk_b, 1), lambda i: (i, 0)),
        compiler_params=pltpu.CompilerParams(
            # chunks are independent -> megacore sharding on v7x.
            dimension_semantics=("parallel",),
            vmem_limit_bytes=32 * 1024 * 1024),
    )(x, w_slab, p_slab)


def reference_forward(x, params, chunk_b=None, mirror_bf16=True):
    """Pure-JAX reference.  mirror_bf16=True mirrors the kernel's precision
    choices (bf16 operands into the matmul, f32 accumulation / BN / SiLU) so
    the comparison isolates kernel bugs; mirror_bf16=False is the plain f32
    model (loose check only)."""
    (w1, g1, be1, w2, g2, be2, w3, g3, be3, w4, g4, be4, w5_row, b5) = params
    B = x.shape[0]
    if chunk_b is None:
        chunk_b = B
    mm_dtype = jnp.bfloat16 if mirror_bf16 else jnp.float32

    def layer(h, w, g, be):
        z = jnp.dot(h.astype(mm_dtype), w.astype(mm_dtype),
                    preferred_element_type=jnp.float32)
        mean = jnp.mean(z, axis=0, keepdims=True)
        c = z - mean
        var = jnp.mean(c * c, axis=0, keepdims=True)
        zbn = c * (g * jax.lax.rsqrt(var + EPS)) + be
        return zbn * jax.nn.sigmoid(zbn)

    def one_chunk(xc):
        h = layer(xc, w1, g1, be1)
        h = layer(h, w2, g2, be2)
        h = layer(h, w3, g3, be3)
        h = layer(h, w4, g4, be4)
        return jnp.sum(h * w5_row, axis=-1, keepdims=True) + b5

    xr = x.reshape(B // chunk_b, chunk_b, x.shape[1])
    return jax.vmap(one_chunk)(xr).reshape(B, 1)


if __name__ == "__main__":
    key = jax.random.PRNGKey(0)
    k_x, k_p = jax.random.split(key)

    params = init_params(k_p)
    w_slab, p_slab = pack_params(params)

    # Case 1: one 16-row batch (single grid step, full-batch BN statistics).
    chunk_b = 16
    x1 = jax.random.normal(k_x, (chunk_b, INPUT_DIM), jnp.float32)
    out1 = jax.block_until_ready(
        improved_heart_disease_forward(x1, w_slab, p_slab))
    assert out1.shape == (chunk_b, 1), out1.shape
    ref1 = reference_forward(x1, params, chunk_b=chunk_b)
    err1 = float(jnp.max(jnp.abs(out1 - ref1)))
    assert err1 < 2e-4, err1

    # Case 2: 4 independent 16-row batches in ONE pallas_call — weights stay
    # VMEM-resident across the "parallel" grid axis (both TCs on v7x).
    num_chunks = 4
    x2 = jax.random.normal(jax.random.fold_in(k_x, 1),
                           (num_chunks * chunk_b, INPUT_DIM), jnp.float32)
    out2 = jax.block_until_ready(
        improved_heart_disease_forward(x2, w_slab, p_slab, chunk_b=chunk_b))
    assert out2.shape == (num_chunks * chunk_b, 1), out2.shape
    ref2 = reference_forward(x2, params, chunk_b=chunk_b)
    err2 = float(jnp.max(jnp.abs(out2 - ref2)))
    assert err2 < 2e-4, err2

    # Loose sanity bound vs. the full-f32 model: documents the bf16
    # storage/MXU-feed divergence that the mirrored checks cannot see.
    ref_f32 = reference_forward(x1, params, chunk_b=chunk_b, mirror_bf16=False)
    err_f32 = float(jnp.max(jnp.abs(out1 - ref_f32)))
    assert err_f32 < 0.5, err_f32

    print("KERNEL_OK")
</pallas_src>

<mosaic_0001>
module attributes {stable_mosaic.version = 11 : i64} {
  func.func @mlp_kernel(%arg0: i32, %arg1: memref<16x18xf32, #tpu.memory_space<vmem>>, %arg2: memref<536x256xbf16, #tpu.memory_space<vmem>>, %arg3: memref<8x256xf32, #tpu.memory_space<vmem>>, %arg4: memref<16x1xf32, #tpu.memory_space<vmem>>) attributes {dimension_semantics = [#tpu.dimension_semantics<parallel>], iteration_bounds = array<i64: 1>, scalar_prefetch = 0 : i64, scratch_operands = 0 : i64, tpu.core_type = #tpu.core_type<tc>, window_params = [{transform_indices = @transform_0, window_bounds = array<i64: 16, 18>}, {pipeline_mode = #tpu.pipeline_mode<synchronous>, transform_indices = @transform_1, window_bounds = array<i64: 536, 256>}, {pipeline_mode = #tpu.pipeline_mode<synchronous>, transform_indices = @transform_2, window_bounds = array<i64: 8, 256>}, {transform_indices = @transform_3, window_bounds = array<i64: 16, 1>}]} {
    %c0 = arith.constant 0 : index
    %c0_0 = arith.constant 0 : index
    %0 = vector.load %arg1[%c0, %c0_0] : memref<16x18xf32, #tpu.memory_space<vmem>>, vector<16x18xf32>
    %c0_1 = arith.constant 0 : index
    %c0_2 = arith.constant 0 : index
    %1 = vector.load %arg2[%c0_1, %c0_2] : memref<536x256xbf16, #tpu.memory_space<vmem>>, vector<18x256xbf16>
    %c0_3 = arith.constant 0 : index
    %c0_4 = arith.constant 0 : index
    %2 = vector.load %arg3[%c0_3, %c0_4] : memref<8x256xf32, #tpu.memory_space<vmem>>, vector<1x256xf32>
    %c1 = arith.constant 1 : index
    %c0_5 = arith.constant 0 : index
    %3 = vector.load %arg3[%c1, %c0_5] : memref<8x256xf32, #tpu.memory_space<vmem>>, vector<1x256xf32>
    %4 = arith.truncf %0 : vector<16x18xf32> to vector<16x18xbf16>
    %cst = arith.constant dense<0.000000e+00> : vector<16x256xf32>
    %5 = tpu.matmul %4, %1, %cst {dimension_numbers = #tpu.dot_dimension_numbers<[1], [0], [0], [1], [0, 0, 1, 1], [], []>} : vector<16x18xbf16>, vector<18x256xbf16>, vector<16x256xf32> -> vector<16x256xf32>
    %cst_6 = arith.constant dense<0.000000e+00> : vector<256xf32>
    %6 = vector.multi_reduction <add>, %5, %cst_6 [0] : vector<16x256xf32> to vector<256xf32>
    %7 = vector.shape_cast %6 : vector<256xf32> to vector<1x256xf32>
    %cst_7 = arith.constant 6.250000e-02 : f32
    %8 = vector.broadcast %cst_7 : f32 to vector<1x256xf32>
    %9 = arith.mulf %7, %8 : vector<1x256xf32>
    %10 = vector.broadcast %9 : vector<1x256xf32> to vector<16x256xf32>
    %11 = arith.subf %5, %10 : vector<16x256xf32>
    %12 = arith.mulf %11, %11 : vector<16x256xf32>
    %cst_8 = arith.constant dense<0.000000e+00> : vector<256xf32>
    %13 = vector.multi_reduction <add>, %12, %cst_8 [0] : vector<16x256xf32> to vector<256xf32>
    %14 = vector.shape_cast %13 : vector<256xf32> to vector<1x256xf32>
    %cst_9 = arith.constant 6.250000e-02 : f32
    %15 = vector.broadcast %cst_9 : f32 to vector<1x256xf32>
    %16 = arith.mulf %14, %15 : vector<1x256xf32>
    %cst_10 = arith.constant 9.99999974E-6 : f32
    %17 = vector.broadcast %cst_10 : f32 to vector<1x256xf32>
    %18 = arith.addf %16, %17 : vector<1x256xf32>
    %19 = math.rsqrt %18 : vector<1x256xf32>
    %20 = arith.mulf %2, %19 : vector<1x256xf32>
    %21 = vector.broadcast %20 : vector<1x256xf32> to vector<16x256xf32>
    %22 = arith.mulf %11, %21 : vector<16x256xf32>
    %23 = vector.broadcast %3 : vector<1x256xf32> to vector<16x256xf32>
    %24 = arith.addf %22, %23 : vector<16x256xf32>
    %25 = arith.negf %24 : vector<16x256xf32>
    %26 = math.exp %25 : vector<16x256xf32>
    %cst_11 = arith.constant 1.000000e+00 : f32
    %27 = vector.broadcast %cst_11 : f32 to vector<16x256xf32>
    %28 = arith.addf %27, %26 : vector<16x256xf32>
    %29 = arith.divf %27, %28 : vector<16x256xf32>
    %30 = arith.mulf %24, %29 : vector<16x256xf32>
    %c24 = arith.constant 24 : index
    %c0_12 = arith.constant 0 : index
    %31 = vector.load %arg2[%c24, %c0_12] : memref<536x256xbf16, #tpu.memory_space<vmem>>, vector<256x128xbf16>
    %c2 = arith.constant 2 : index
    %c0_13 = arith.constant 0 : index
    %32 = vector.load %arg3[%c2, %c0_13] : memref<8x256xf32, #tpu.memory_space<vmem>>, vector<1x128xf32>
    %c2_14 = arith.constant 2 : index
    %c128 = arith.constant 128 : index
    %33 = vector.load %arg3[%c2_14, %c128] : memref<8x256xf32, #tpu.memory_space<vmem>>, vector<1x128xf32>
    %34 = arith.truncf %30 : vector<16x256xf32> to vector<16x256xbf16>
    %cst_15 = arith.constant dense<0.000000e+00> : vector<16x128xf32>
    %35 = tpu.matmul %34, %31, %cst_15 {dimension_numbers = #tpu.dot_dimension_numbers<[1], [0], [0], [1], [0, 0, 1, 1], [], []>} : vector<16x256xbf16>, vector<256x128xbf16>, vector<16x128xf32> -> vector<16x128xf32>
    %cst_16 = arith.constant dense<0.000000e+00> : vector<128xf32>
    %36 = vector.multi_reduction <add>, %35, %cst_16 [0] : vector<16x128xf32> to vector<128xf32>
    %37 = vector.shape_cast %36 : vector<128xf32> to vector<1x128xf32>
    %cst_17 = arith.constant 6.250000e-02 : f32
    %38 = vector.broadcast %cst_17 : f32 to vector<1x128xf32>
    %39 = arith.mulf %37, %38 : vector<1x128xf32>
    %40 = vector.broadcast %39 : vector<1x128xf32> to vector<16x128xf32>
    %41 = arith.subf %35, %40 : vector<16x128xf32>
    %42 = arith.mulf %41, %41 : vector<16x128xf32>
    %cst_18 = arith.constant dense<0.000000e+00> : vector<128xf32>
    %43 = vector.multi_reduction <add>, %42, %cst_18 [0] : vector<16x128xf32> to vector<128xf32>
    %44 = vector.shape_cast %43 : vector<128xf32> to vector<1x128xf32>
    %cst_19 = arith.constant 6.250000e-02 : f32
    %45 = vector.broadcast %cst_19 : f32 to vector<1x128xf32>
    %46 = arith.mulf %44, %45 : vector<1x128xf32>
    %cst_20 = arith.constant 9.99999974E-6 : f32
    %47 = vector.broadcast %cst_20 : f32 to vector<1x128xf32>
    %48 = arith.addf %46, %47 : vector<1x128xf32>
    %49 = math.rsqrt %48 : vector<1x128xf32>
    %50 = arith.mulf %32, %49 : vector<1x128xf32>
    %51 = vector.broadcast %50 : vector<1x128xf32> to vector<16x128xf32>
    %52 = arith.mulf %41, %51 : vector<16x128xf32>
    %53 = vector.broadcast %33 : vector<1x128xf32> to vector<16x128xf32>
    %54 = arith.addf %52, %53 : vector<16x128xf32>
    %55 = arith.negf %54 : vector<16x128xf32>
    %56 = math.exp %55 : vector<16x128xf32>
    %cst_21 = arith.constant 1.000000e+00 : f32
    %57 = vector.broadcast %cst_21 : f32 to vector<16x128xf32>
    %58 = arith.addf %57, %56 : vector<16x128xf32>
    %59 = arith.divf %57, %58 : vector<16x128xf32>
    %60 = arith.mulf %54, %59 : vector<16x128xf32>
    %c280 = arith.constant 280 : index
    %c0_22 = arith.constant 0 : index
    %61 = vector.load %arg2[%c280, %c0_22] : memref<536x256xbf16, #tpu.memory_space<vmem>>, vector<128x128xbf16>
    %c3 = arith.constant 3 : index
    %c0_23 = arith.constant 0 : index
    %62 = vector.load %arg3[%c3, %c0_23] : memref<8x256xf32, #tpu.memory_space<vmem>>, vector<1x128xf32>
    %c3_24 = arith.constant 3 : index
    %c128_25 = arith.constant 128 : index
    %63 = vector.load %arg3[%c3_24, %c128_25] : memref<8x256xf32, #tpu.memory_space<vmem>>, vector<1x128xf32>
    %64 = arith.truncf %60 : vector<16x128xf32> to vector<16x128xbf16>
    %cst_26 = arith.constant dense<0.000000e+00> : vector<16x128xf32>
    %65 = tpu.matmul %64, %61, %cst_26 {dimension_numbers = #tpu.dot_dimension_numbers<[1], [0], [0], [1], [0, 0, 1, 1], [], []>} : vector<16x128xbf16>, vector<128x128xbf16>, vector<16x128xf32> -> vector<16x128xf32>
    %cst_27 = arith.constant dense<0.000000e+00> : vector<128xf32>
    %66 = vector.multi_reduction <add>, %65, %cst_27 [0] : vector<16x128xf32> to vector<128xf32>
    %67 = vector.shape_cast %66 : vector<128xf32> to vector<1x128xf32>
    %cst_28 = arith.constant 6.250000e-02 : f32
    %68 = vector.broadcast %cst_28 : f32 to vector<1x128xf32>
    %69 = arith.mulf %67, %68 : vector<1x128xf32>
    %70 = vector.broadcast %69 : vector<1x128xf32> to vector<16x128xf32>
    %71 = arith.subf %65, %70 : vector<16x128xf32>
    %72 = arith.mulf %71, %71 : vector<16x128xf32>
    %cst_29 = arith.constant dense<0.000000e+00> : vector<128xf32>
    %73 = vector.multi_reduction <add>, %72, %cst_29 [0] : vector<16x128xf32> to vector<128xf32>
    %74 = vector.shape_cast %73 : vector<128xf32> to vector<1x128xf32>
    %cst_30 = arith.constant 6.250000e-02 : f32
    %75 = vector.broadcast %cst_30 : f32 to vector<1x128xf32>
    %76 = arith.mulf %74, %75 : vector<1x128xf32>
    %cst_31 = arith.constant 9.99999974E-6 : f32
    %77 = vector.broadcast %cst_31 : f32 to vector<1x128xf32>
    %78 = arith.addf %76, %77 : vector<1x128xf32>
    %79 = math.rsqrt %78 : vector<1x128xf32>
    %80 = arith.mulf %62, %79 : vector<1x128xf32>
    %81 = vector.broadcast %80 : vector<1x128xf32> to vector<16x128xf32>
    %82 = arith.mulf %71, %81 : vector<16x128xf32>
    %83 = vector.broadcast %63 : vector<1x128xf32> to vector<16x128xf32>
    %84 = arith.addf %82, %83 : vector<16x128xf32>
    %85 = arith.negf %84 : vector<16x128xf32>
    %86 = math.exp %85 : vector<16x128xf32>
    %cst_32 = arith.constant 1.000000e+00 : f32
    %87 = vector.broadcast %cst_32 : f32 to vector<16x128xf32>
    %88 = arith.addf %87, %86 : vector<16x128xf32>
    %89 = arith.divf %87, %88 : vector<16x128xf32>
    %90 = arith.mulf %84, %89 : vector<16x128xf32>
    %c408 = arith.constant 408 : index
    %c0_33 = arith.constant 0 : index
    %91 = vector.load %arg2[%c408, %c0_33] : memref<536x256xbf16, #tpu.memory_space<vmem>>, vector<128x128xbf16>
    %c4 = arith.constant 4 : index
    %c0_34 = arith.constant 0 : index
    %92 = vector.load %arg3[%c4, %c0_34] : memref<8x256xf32, #tpu.memory_space<vmem>>, vector<1x128xf32>
    %c4_35 = arith.constant 4 : index
    %c128_36 = arith.constant 128 : index
    %93 = vector.load %arg3[%c4_35, %c128_36] : memref<8x256xf32, #tpu.memory_space<vmem>>, vector<1x128xf32>
    %94 = arith.truncf %90 : vector<16x128xf32> to vector<16x128xbf16>
    %cst_37 = arith.constant dense<0.000000e+00> : vector<16x128xf32>
    %95 = tpu.matmul %94, %91, %cst_37 {dimension_numbers = #tpu.dot_dimension_numbers<[1], [0], [0], [1], [0, 0, 1, 1], [], []>} : vector<16x128xbf16>, vector<128x128xbf16>, vector<16x128xf32> -> vector<16x128xf32>
    %cst_38 = arith.constant dense<0.000000e+00> : vector<128xf32>
    %96 = vector.multi_reduction <add>, %95, %cst_38 [0] : vector<16x128xf32> to vector<128xf32>
    %97 = vector.shape_cast %96 : vector<128xf32> to vector<1x128xf32>
    %cst_39 = arith.constant 6.250000e-02 : f32
    %98 = vector.broadcast %cst_39 : f32 to vector<1x128xf32>
    %99 = arith.mulf %97, %98 : vector<1x128xf32>
    %100 = vector.broadcast %99 : vector<1x128xf32> to vector<16x128xf32>
    %101 = arith.subf %95, %100 : vector<16x128xf32>
    %102 = arith.mulf %101, %101 : vector<16x128xf32>
    %cst_40 = arith.constant dense<0.000000e+00> : vector<128xf32>
    %103 = vector.multi_reduction <add>, %102, %cst_40 [0] : vector<16x128xf32> to vector<128xf32>
    %104 = vector.shape_cast %103 : vector<128xf32> to vector<1x128xf32>
    %cst_41 = arith.constant 6.250000e-02 : f32
    %105 = vector.broadcast %cst_41 : f32 to vector<1x128xf32>
    %106 = arith.mulf %104, %105 : vector<1x128xf32>
    %cst_42 = arith.constant 9.99999974E-6 : f32
    %107 = vector.broadcast %cst_42 : f32 to vector<1x128xf32>
    %108 = arith.addf %106, %107 : vector<1x128xf32>
    %109 = math.rsqrt %108 : vector<1x128xf32>
    %110 = arith.mulf %92, %109 : vector<1x128xf32>
    %111 = vector.broadcast %110 : vector<1x128xf32> to vector<16x128xf32>
    %112 = arith.mulf %101, %111 : vector<16x128xf32>
    %113 = vector.broadcast %93 : vector<1x128xf32> to vector<16x128xf32>
    %114 = arith.addf %112, %113 : vector<16x128xf32>
    %115 = arith.negf %114 : vector<16x128xf32>
    %116 = math.exp %115 : vector<16x128xf32>
    %cst_43 = arith.constant 1.000000e+00 : f32
    %117 = vector.broadcast %cst_43 : f32 to vector<16x128xf32>
    %118 = arith.addf %117, %116 : vector<16x128xf32>
    %119 = arith.divf %117, %118 : vector<16x128xf32>
    %120 = arith.mulf %114, %119 : vector<16x128xf32>
    %c5 = arith.constant 5 : index
    %c0_44 = arith.constant 0 : index
    %121 = vector.load %arg3[%c5, %c0_44] : memref<8x256xf32, #tpu.memory_space<vmem>>, vector<1x128xf32>
    %c5_45 = arith.constant 5 : index
    %c128_46 = arith.constant 128 : index
    %122 = vector.load %arg3[%c5_45, %c128_46] : memref<8x256xf32, #tpu.memory_space<vmem>>, vector<1x1xf32>
    %123 = vector.broadcast %121 : vector<1x128xf32> to vector<16x128xf32>
    %124 = arith.mulf %120, %123 : vector<16x128xf32>
    %cst_47 = arith.constant dense<0.000000e+00> : vector<16xf32>
    %125 = vector.multi_reduction <add>, %124, %cst_47 [1] : vector<16x128xf32> to vector<16xf32>
    %126 = vector.shape_cast %125 : vector<16xf32> to vector<16x1xf32>
    %127 = vector.broadcast %122 : vector<1x1xf32> to vector<16x1xf32>
    %128 = arith.addf %126, %127 : vector<16x1xf32>
    %c0_48 = arith.constant 0 : index
    %c0_49 = arith.constant 0 : index
    %129 = vector.load %arg4[%c0_48, %c0_49] : memref<16x1xf32, #tpu.memory_space<vmem>>, vector<16x1xf32>
    tpu.vector_store %arg4[%c0_48, %c0_49], %128 {strides = array<i32>} : memref<16x1xf32, #tpu.memory_space<vmem>>, vector<16x1xf32>,
    return
  }
  func.func @transform_0(%arg0: i32) -> (i32, i32) {
    %c0_i32 = arith.constant 0 : i32
    %c0_i32_0 = arith.constant 0 : i32
    return %arg0, %c0_i32 : i32, i32
  }
  func.func @transform_1(%arg0: i32) -> (i32, i32) {
    %c0_i32 = arith.constant 0 : i32
    %c0_i32_0 = arith.constant 0 : i32
    %c0_i32_1 = arith.constant 0 : i32
    return %c0_i32, %c0_i32_0 : i32, i32
  }
  func.func @transform_2(%arg0: i32) -> (i32, i32) {
    %c0_i32 = arith.constant 0 : i32
    %c0_i32_0 = arith.constant 0 : i32
    %c0_i32_1 = arith.constant 0 : i32
    return %c0_i32, %c0_i32_0 : i32, i32
  }
  func.func @transform_3(%arg0: i32) -> (i32, i32) {
    %c0_i32 = arith.constant 0 : i32
    %c0_i32_0 = arith.constant 0 : i32
    return %arg0, %c0_i32 : i32, i32
  }
}

</mosaic_0001>

<bundles_post_ra>
// kernel: tpu_custom_call.1
= control target key start
LH: loop header
LB: loop body
LE: loop exit
PB: predicated region body
PF: predicated region fallthrough
CT: control target
= control target key end

     0   :  { %8 = vsyncpa [#allocation3], 0  ;;  %s1174_s0 = inlined_call_operand.hbm [shape: f32[16,18], index: 0, kind: input, shape index: {}]   ;;  %s1175_s1 = inlined_call_operand.hbm [shape: bf16[536,256], index: 1, kind: input, shape index: {}]   ;;  %s1176_s2 = inlined_call_operand.hbm [shape: f32[8,256], index: 2, kind: input, shape index: {}]   ;;  %s1177_s3 = inlined_call_operand.vmem [shape: f32[16,1], index: 3, kind: output, shape index: {}]  }
   0x1   :  { %9 = vsyncpa [#allocation5], 0  ;;  %s1078_s12 = smov [#allocation4]   ;;  %s1079_s14 = smov [#allocation2]  }
   0x2   :  { %s27_s13 = sshll.u32 %s1078_s12, 4  ;;  %s15_s15 = sshll.u32 %s1079_s14, 4  ;;  %s28_s13 = int_to_ptr.vmem [resolvable:$true] %s27_s13  ;;  %s1107_s15 = int_to_ptr.vmem [resolvable:$true] %s15_s15 }
   0x3   :  { %s1008_s18 = scalar_lea.hbm %s1175_s1, 8576 }
   0x4   :  { %p1009_p0 = scmp.ne.s32.totalorder %s1175_s1, %s1008_s18  ;;  %p1012_p1 = scmp.lt.u32.totalorder %s1008_s18, %s1175_s1 }
   0x6   :  { %p1014_p2 = pnand %p1012_p1, %p1009_p0 }
   0x8   :  { %1017 = shalt.err (!%p1014_p2)
}
   0x9   :  { %s1018_s23 = scalar_lea.vmem %s28_s13, 8576  ;;  %p1023_p4 = scmp.lt.s32.totalorder %s28_s13, %s28_s13 }
   0xa   :  { %p1019_p3 = scmp.ne.s32.totalorder %s28_s13, %s1018_s23  ;;  %p1024_p5 = scmp.lt.s32.totalorder %s1018_s23, %s1018_s23 }
   0xc   :  { %p1025_p6 = por %p1024_p5, %p1023_p4 }
   0xe   :  { %p1026_p7 = pnand %p1025_p6, %p1019_p3 }
  0x10   :  { %1029 = shalt.err (!%p1026_p7)
}
  0x11   :  { %s1080_s24 = smov 128   ;;  %s1081_s25 = smov 8  }
  0x12   :  { %33 = dma.hbm_to_vmem [thread:$0]  %s1175_s1, 8576, %s28_s13, [#allocation5], %s1080_s24, %s1080_s24, %s1081_s25  }
  0x13   :  { %s1030_s30 = scalar_lea.hbm %s1174_s0, 256 }
  0x14   :  { %p1031_p8 = scmp.ne.s32.totalorder %s1174_s0, %s1030_s30  ;;  %p1034_p9 = scmp.lt.u32.totalorder %s1030_s30, %s1174_s0 }
  0x16   :  { %p1036_p10 = pnand %p1034_p9, %p1031_p8 }
  0x18   :  { %1039 = shalt.err (!%p1036_p10)
}
  0x19   :  { %s1040_s8 = scalar_lea.vmem %s1107_s15, 256  ;;  %p1045_p12 = scmp.lt.s32.totalorder %s1107_s15, %s1107_s15 }
  0x1a   :  { %p1041_p11 = scmp.ne.s32.totalorder %s1107_s15, %s1040_s8  ;;  %p1046_p13 = scmp.lt.s32.totalorder %s1040_s8, %s1040_s8 }
  0x1c   :  { %p1047_p0 = por %p1046_p13, %p1045_p12 }
  0x1e   :  { %p1048_p1 = pnand %p1047_p0, %p1041_p11 }
  0x20   :  { %1051 = shalt.err (!%p1048_p1)
}
  0x21   :  { %21 = dma.hbm_to_vmem [thread:$0]  %s1174_s0, 256, %s1107_s15, [#allocation3], %s1080_s24, %s1080_s24, %s1081_s25  }
  0x22   :  { %s1082_s10 = smov [#allocation6]   ;;  %s1052_s14 = scalar_lea.hbm %s1176_s2, 256 }
  0x23   :  { %s40_s11 = sshll.u32 %s1082_s10, 4  ;;  %p1053_p2 = scmp.ne.s32.totalorder %s1176_s2, %s1052_s14  ;;  %s41_s11 = int_to_ptr.vmem [resolvable:$true] %s40_s11 }
  0x24   :  { %p1056_p3 = scmp.lt.u32.totalorder %s1052_s14, %s1176_s2 }
  0x26   :  { %p1058_p4 = pnand %p1056_p3, %p1053_p2 }
  0x28   :  { %1061 = shalt.err (!%p1058_p4)
}
  0x29   :  { %s1062_s20 = scalar_lea.vmem %s41_s11, 256  ;;  %p1067_p6 = scmp.lt.s32.totalorder %s41_s11, %s41_s11 }
  0x2a   :  { %p1063_p5 = scmp.ne.s32.totalorder %s41_s11, %s1062_s20  ;;  %p1068_p7 = scmp.lt.s32.totalorder %s1062_s20, %s1062_s20 }
  0x2c   :  { %p1069_p8 = por %p1068_p7, %p1067_p6 }
  0x2e   :  { %p1070_p9 = pnand %p1069_p8, %p1063_p5 }
  0x30   :  { %1073 = shalt.err (!%p1070_p9)
}
  0x31   :  { %43 = dma.hbm_to_vmem [thread:$0]  %s1176_s2, 256, %s41_s11, [#allocation5]  }
  0x32   :  { %1074 = dma.done.wait [#allocation3], 256  }
  0x33   :  { %1075 = vsyncadd [#allocation3], 4294967040 }
  0x34   :  { %1076 = dma.done.wait [#allocation5], 8832  }
  0x35   :  { %1077 = vsyncadd [#allocation5], 4294958464  ;;  %v1083_v0 = vmov 0   ;;  %v921_v1 = vld [vmem:[#allocation4 + $0x4] ss:$8 sps:$4 sm:$0xff]   ;;  %vm82_vm0 = vcmask 1040384  }
  0x36   :  { %121 = vmatprep.mubr.bf16.mxu0 %v1083_v0  ;;  %v923_v2 = vld [vmem:[#allocation4] ss:$8 sps:$4 sm:$0xff]   ;;  %v58_v3 = vld [vmem:[#allocation4 + $0x10] sm:$0x11]  ;;  %89 = vmatprep.subr.bf16.mxu0 %v921_v1  ;;  %v55_v7 = vld [vmem:[#allocation2 + $0x8] sm:$0xff]  ;;  %vm78_vm1 = vcmask 146432  }
  0x37   :  { %v54_v4 = vld [vmem:[#allocation2] sm:$0xff]  ;;  %v787_v5 = vcombine.high %v58_v3, %v58_v3  ;;  %v786_v6 = vcombine.low %v58_v3, %v58_v3  ;;  %90 = vmatpush1.bf16.msra.mxu0 %v923_v2  ;;  %v926_v10 = vld [vmem:[#allocation4 + $0x98] ss:$8 sps:$4 sm:$0xff]   ;;  %vm1086_vm2 = vmmov 0   ;;  %vm775_vm3 = vcmask 7168  }
  0x38   :  { %v62_v9 = vpack.c.bf16 %v55_v7, %v54_v4  ;;  %v927_v11 = vld [vmem:[#allocation4 + $0x18] ss:$8 sps:$4 sm:$0xff]   ;;  %v928_v12 = vld [vmem:[#allocation4 + $0xa8] ss:$8 sps:$4 sm:$0xff]   ;;  %832 = vmatprep.subr.bf16.mxu1 %v926_v10  ;;  %v182_v10 = vlaneseq }
  0x39   :  { %788 = vmatprep.subr.msk.bf16.mxu0 %vm82_vm0, %v787_v5  ;;  %v84_v8 = vsel %vm82_vm0, %v786_v6, 0  ;;  %833 = vmatpush3.bf16.msra.mxu1 %v927_v11  ;;  %v929_v13 = vld [vmem:[#allocation4 + $0x28] ss:$8 sps:$4 sm:$0xff]   ;;  %v930_v14 = vld [vmem:[#allocation4 + $0xb8] ss:$8 sps:$4 sm:$0xff]  }
  0x3a   :  { %834 = vmatprep.subr.bf16.mxu1 %v928_v12  ;;  %v931_v15 = vld [vmem:[#allocation4 + $0x38] ss:$8 sps:$4 sm:$0xff]   ;;  %v932_v16 = vld [vmem:[#allocation4 + $0xc8] ss:$8 sps:$4 sm:$0xff]   ;;  %v183_v12 = vshrl.u32 %v182_v10, 7 }
  0x3b   :  { %92 = vmatpush1.bf16.msra.mxu0 %v84_v8  ;;  %v933_v17 = vld [vmem:[#allocation4 + $0x48] ss:$8 sps:$4 sm:$0xff]   ;;  %v934_v18 = vld [vmem:[#allocation4 + $0xd8] ss:$8 sps:$4 sm:$0xff]   ;;  %v1084_v8 = vmov 1966171168  }
  0x3c   :  { %v935_v19 = vld [vmem:[#allocation4 + $0x58] ss:$8 sps:$4 sm:$0xff]   ;;  %v936_v20 = vld [vmem:[#allocation4 + $0xe8] ss:$8 sps:$4 sm:$0xff]  }
  0x3d   :  { %835 = vmatpush3.bf16.msra.mxu1 %v929_v13  ;;  %v937_v21 = vld [vmem:[#allocation4 + $0x68] ss:$8 sps:$4 sm:$0xff]   ;;  %v938_v22 = vld [vmem:[#allocation4 + $0xf8] ss:$8 sps:$4 sm:$0xff]  }
  0x3e   :  { %789 = vmatmul.mubr.msk.bf16.vlgmr.msra.gmra.mrb[0].mxu0 %vm78_vm1, %v62_v9  ;;  %836 = vmatprep.subr.bf16.mxu1 %v930_v14  ;;  %v939_v23 = vld [vmem:[#allocation4 + $0x78] ss:$8 sps:$4 sm:$0xff]   ;;  %v940_v24 = vld [vmem:[#allocation4 + $0x108] ss:$8 sps:$4 sm:$0xff]   ;;  %v180_v9 = vunpack.c.l.s4 %v1084_v8 }
  0x3f   :  { %v941_v25 = vld [vmem:[#allocation4 + $0x88] ss:$8 sps:$4 sm:$0xff]  }
  0x40   :  { %v181_v11 = vunpack.c.0.s8 %v180_v9 }
  0x41   :  { %837 = vmatpush3.bf16.msra.mxu1 %v931_v15 }
  0x42   :  { %838 = vmatprep.subr.bf16.mxu1 %v932_v16  ;;  %v184_v14 = vsub.s32 %v181_v11, %v183_v12 }
  0x45   :  { %839 = vmatpush3.bf16.msra.mxu1 %v933_v17 }
  0x46   :  { %840 = vmatprep.subr.bf16.mxu1 %v934_v18  ;;  %v59_v18 = vld [vmem:[#allocation6] ss:$8 sm:$0x3] }
  0x49   :  { %841 = vmatpush3.bf16.msra.mxu1 %v935_v19 }
  0x4a   :  { %842 = vmatprep.subr.bf16.mxu1 %v936_v20  ;;  %v198_v20 = vsub.s32 0, %v183_v12 }
  0x4d   :  { %843 = vmatpush3.bf16.msra.mxu1 %v937_v21  ;;  %v202_v21 = vsub.s32 1, %v183_v12 }
  0x4e   :  { %844 = vmatprep.subr.bf16.mxu1 %v938_v22  ;;  %v61_v22 = vld [vmem:[#allocation6 + $0x1] ss:$8 sm:$0x3] }
  0x51   :  { %845 = vmatpush3.bf16.msra.mxu1 %v939_v23 }
  0x52   :  { %846 = vmatprep.subr.bf16.mxu1 %v940_v24 }
  0x55   :  { %847 = vmatpush3.bf16.msra.mxu1 %v941_v25 }
 0x111   :  { %v123_v26 = vpop.f32.mrb[0].mxu0 }
 0x112   :  { %v125_v27 = vpop.f32.mrb[1].mxu0 }
 0x113   :  { %v127_v28 = vpop.f32.mrb[2].mxu0 }
 0x114   :  { %v132_v29 = vadd.f32 %v127_v28, %v123_v26  ;;  %v129_v30 = vpop.f32.mrb[3].mxu0 }
 0x115   :  { %v139_v31 = vadd.f32 %v129_v30, %v125_v27 }
 0x116   :  { %v133_v32 = vrot.slane %v132_v29, 4 }
 0x117   :  { %v140_v33 = vrot.slane %v139_v31, 4 }
 0x118   :  { %v134_v34 = vadd.f32 %v133_v32, %v132_v29 }
 0x119   :  { %v141_v35 = vadd.f32 %v140_v33, %v139_v31 }
 0x11a   :  { %v135_v36 = vrot.slane %v134_v34, 2 }
 0x11b   :  { %v142_v37 = vrot.slane %v141_v35, 2 }
 0x11c   :  { %v136_v38 = vadd.f32 %v135_v36, %v134_v34 }
 0x11d   :  { %v143_v39 = vadd.f32 %v142_v37, %v141_v35 }
 0x11e   :  { %v137_v40 = vrot.slane %v136_v38, 1 }
 0x11f   :  { %v144_v41 = vrot.slane %v143_v39, 1 }
 0x120   :  { %v138_v42 = vadd.f32 %v137_v40, %v136_v38 }
 0x121   :  { %v145_v43 = vadd.f32 %v144_v41, %v143_v39 }
 0x122   :  { %v146_v44 = vmul.f32 0.0625, %v138_v42 }
 0x123   :  { %v147_v45 = vmul.f32 0.0625, %v145_v43 }
 0x124   :  { %v148_v46 = vsub.f32 %v123_v26, %v146_v44  ;;  %v150_v47 = vsub.f32 %v127_v28, %v146_v44  ;;  %v214_v26 = vrot.slane %v61_v22, %v198_v20 }
 0x125   :  { %v149_v48 = vsub.f32 %v125_v27, %v147_v45  ;;  %v151_v49 = vsub.f32 %v129_v30, %v147_v45  ;;  %v218_v27 = vrot.slane %v61_v22, %v202_v21 }
 0x126   :  { %v152_v50 = vmul.f32 %v148_v46, %v148_v46  ;;  %v154_v51 = vmul.f32 %v150_v47, %v150_v47 }
 0x127   :  { %v153_v52 = vmul.f32 %v149_v48, %v149_v48  ;;  %v155_v53 = vmul.f32 %v151_v49, %v151_v49 }
 0x128   :  { %v156_v54 = vadd.f32 %v154_v51, %v152_v50 }
 0x129   :  { %v163_v55 = vadd.f32 %v155_v53, %v153_v52 }
 0x12a   :  { %v157_v56 = vrot.slane %v156_v54, 4 }
 0x12b   :  { %v164_v57 = vrot.slane %v163_v55, 4 }
 0x12c   :  { %v158_v58 = vadd.f32 %v157_v56, %v156_v54 }
 0x12d   :  { %v165_v59 = vadd.f32 %v164_v57, %v163_v55 }
 0x12e   :  { %v159_v60 = vrot.slane %v158_v58, 2 }
 0x12f   :  { %v166_v61 = vrot.slane %v165_v59, 2 }
 0x130   :  { %v160_v62 = vadd.f32 %v159_v60, %v158_v58  ;;  %v942_v58 = vld [vmem:[#allocation4 + $0x118] ss:$8 sps:$4 sm:$0xff]   ;;  %v943_v60 = vld [vmem:[#allocation4 + $0x128] ss:$8 sps:$4 sm:$0xff]  }
 0x131   :  { %v167_v63 = vadd.f32 %v166_v61, %v165_v59  ;;  %v1085_v59 = vmov 0.0   ;;  %v944_v61 = vld [vmem:[#allocation4 + $0x138] ss:$8 sps:$4 sm:$0xff]  }
 0x132   :  { %v161_v0 = vrot.slane %v160_v62, 1  ;;  %872 = vmatprep.subr.bf16.mxu0 %v1085_v59  ;;  %892 = vmatprep.subr.bf16.mxu1 %v1085_v59 }
 0x133   :  { %v168_v1 = vrot.slane %v167_v63, 1  ;;  %873 = vmatpush3.bf16.msra.mxu0 %v942_v58  ;;  %888 = vmatprep.mubr.msk.bf16.mxu0 %vm1086_vm2, %v1085_v59 }
 0x134   :  { %v162_v2 = vadd.f32 %v161_v0, %v160_v62  ;;  %874 = vmatprep.subr.bf16.mxu0 %v1085_v59  ;;  %v945_v62 = vld [vmem:[#allocation4 + $0x148] ss:$8 sps:$4 sm:$0xff]  }
 0x135   :  { %v169_v3 = vadd.f32 %v168_v1, %v167_v63  ;;  %v946_v63 = vld [vmem:[#allocation4 + $0x158] ss:$8 sps:$4 sm:$0xff]   ;;  %v947_v0 = vld [vmem:[#allocation4 + $0x168] ss:$8 sps:$4 sm:$0xff]  }
 0x136   :  { %v170_v4 = vmul.f32 0.0625, %v162_v2  ;;  %v948_v1 = vld [vmem:[#allocation4 + $0x178] ss:$8 sps:$4 sm:$0xff]   ;;  %v949_v2 = vld [vmem:[#allocation4 + $0x188] ss:$8 sps:$4 sm:$0xff]  }
 0x137   :  { %v171_v5 = vmul.f32 0.0625, %v169_v3  ;;  %875 = vmatpush3.bf16.msra.mxu0 %v943_v60 }
 0x138   :  { %v172_v6 = vadd.f32 1e-05, %v170_v4  ;;  %876 = vmatprep.subr.bf16.mxu0 %v1085_v59 }
 0x139   :  { %v173_v7 = vadd.f32 1e-05, %v171_v5 }
 0x13a   :  { %958 = vrsqrt.f32 %v172_v6 }
 0x13b   :  { %960 = vrsqrt.f32 %v173_v7  ;;  %877 = vmatpush3.bf16.msra.mxu0 %v944_v61 }
 0x13c   :  { %878 = vmatprep.subr.bf16.mxu0 %v1085_v59 }
 0x13f   :  { %879 = vmatpush3.bf16.msra.mxu0 %v945_v62 }
 0x140   :  { %880 = vmatprep.subr.bf16.mxu0 %v1085_v59 }
 0x143   :  { %881 = vmatpush3.bf16.msra.mxu0 %v946_v63 }
 0x144   :  { %v959_v13 = vpop.eup %958  ;;  %882 = vmatprep.subr.bf16.mxu0 %v1085_v59 }
 0x145   :  { %v961_v15 = vpop.eup %960 }
 0x146   :  { %v178_v16 = vcombine.low %v959_v13, %v961_v15 }
 0x147   :  { %883 = vmatpush3.bf16.msra.mxu0 %v947_v0 }
 0x148   :  { %v185_v17 = vrot.slane %v178_v16, %v184_v14  ;;  %884 = vmatprep.subr.bf16.mxu0 %v1085_v59 }
 0x14a   :  { %v192_v19 = vrot.slane %v185_v17, %v184_v14 }
 0x14b   :  { %885 = vmatpush3.bf16.msra.mxu0 %v948_v1 }
 0x14c   :  { %v194_v23 = vmul.f32 %v192_v19, %v59_v18  ;;  %886 = vmatprep.subr.bf16.mxu0 %v1085_v59 }
 0x14e   :  { %v199_v24 = vrot.slane %v194_v23, %v198_v20  ;;  %v203_v25 = vrot.slane %v194_v23, %v202_v21 }
 0x14f   :  { %887 = vmatpush3.bf16.msra.mxu0 %v949_v2 }
 0x150   :  { %v209_v28 = vmul.f32 %v203_v25, %v151_v49  ;;  %v207_v29 = vmul.f32 %v203_v25, %v149_v48  ;;  %v206_v30 = vmul.f32 %v199_v24, %v148_v46  ;;  %v208_v31 = vmul.f32 %v199_v24, %v150_v47 }
 0x152   :  { %v222_v32 = vadd.f32 %v218_v27, %v207_v29  ;;  %v224_v33 = vadd.f32 %v218_v27, %v209_v28  ;;  %v221_v34 = vadd.f32 %v214_v26, %v206_v30  ;;  %v223_v35 = vadd.f32 %v214_v26, %v208_v31  ;;  %v285_v30 = vld [vmem:[#allocation6 + $0x2] ss:$0 sm:$0xff] }
 0x154   :  { %v791_v36 = vmul.f32 -1.442695, %v222_v32  ;;  %v793_v37 = vmul.f32 -1.442695, %v224_v33  ;;  %v790_v38 = vmul.f32 -1.442695, %v221_v34 }
 0x155   :  { %v792_v39 = vmul.f32 -1.442695, %v223_v35 }
 0x156   :  { %962 = vpow2.f32 %v791_v36 }
 0x157   :  { %964 = vpow2.f32 %v793_v37 }
 0x158   :  { %966 = vpow2.f32 %v790_v38 }
 0x159   :  { %968 = vpow2.f32 %v792_v39 }
 0x160   :  { %v963_v40 = vpop.eup %962 }
 0x161   :  { %v965_v41 = vpop.eup %964  ;;  %v238_v42 = vadd.f32 1.0, %v963_v40 }
 0x162   :  { %v967_v43 = vpop.eup %966  ;;  %v240_v44 = vadd.f32 1.0, %v965_v41 }
 0x163   :  { %v969_v45 = vpop.eup %968  ;;  %970 = vrcp.f32 %v238_v42  ;;  %v237_v46 = vadd.f32 1.0, %v967_v43 }
 0x164   :  { %972 = vrcp.f32 %v240_v44  ;;  %v239_v47 = vadd.f32 1.0, %v969_v45 }
 0x165   :  { %974 = vrcp.f32 %v237_v46 }
 0x166   :  { %976 = vrcp.f32 %v239_v47 }
 0x16d   :  { %v971_v48 = vpop.eup %970 }
 0x16e   :  { %v973_v49 = vpop.eup %972  ;;  %v250_v50 = vmul.f32 %v971_v48, %v222_v32 }
 0x16f   :  { %v975_v51 = vpop.eup %974  ;;  %v252_v52 = vmul.f32 %v973_v49, %v224_v33  ;;  %v286_v33 = vld [vmem:[#allocation6 + $0xa] ss:$0 sm:$0xff] }
 0x170   :  { %v977_v53 = vpop.eup %976  ;;  %v249_v54 = vmul.f32 %v975_v51, %v221_v34  ;;  %v950_v49 = vld [vmem:[#allocation4 + $0x198] ss:$8 sps:$4 sm:$0xff]  }
 0x171   :  { %v288_v55 = vpack.c.bf16 %v252_v52, %v250_v50  ;;  %v251_v56 = vmul.f32 %v977_v53, %v223_v35  ;;  %v951_v50 = vld [vmem:[#allocation4 + $0x1a8] ss:$8 sps:$4 sm:$0xff]   ;;  %v952_v51 = vld [vmem:[#allocation4 + $0x1b8] ss:$8 sps:$4 sm:$0xff]  }
 0x172   :  { %v953_v52 = vld [vmem:[#allocation4 + $0x1c8] ss:$8 sps:$4 sm:$0xff]   ;;  %v954_v53 = vld [vmem:[#allocation4 + $0x1d8] ss:$8 sps:$4 sm:$0xff]  }
 0x173   :  { %417 = vmatprep.mubr.bf16.mxu1 %v288_v55  ;;  %v287_v57 = vpack.c.bf16 %v251_v56, %v249_v54  ;;  %v955_v54 = vld [vmem:[#allocation4 + $0x1e8] ss:$8 sps:$4 sm:$0xff]   ;;  %v956_v55 = vld [vmem:[#allocation4 + $0x1f8] ss:$8 sps:$4 sm:$0xff]  }
 0x174   :  { %v957_v56 = vld [vmem:[#allocation4 + $0x208] ss:$8 sps:$4 sm:$0xff]  }
 0x175   :  { %418 = vmatmul.mubr.bf16.vlgmr.msra.gmra.mrb[0].mxu1 %v287_v57 }
 0x176   :  { %908 = vmatprep.mubr.msk.bf16.mxu1 %vm1086_vm2, %v1085_v59  ;;  %893 = vmatpush3.bf16.msra.mxu1 %v950_v49 }
 0x177   :  { %894 = vmatprep.subr.bf16.mxu1 %v1085_v59 }
 0x17a   :  { %895 = vmatpush3.bf16.msra.mxu1 %v951_v50 }
 0x17b   :  { %896 = vmatprep.subr.bf16.mxu1 %v1085_v59 }
 0x17e   :  { %897 = vmatpush3.bf16.msra.mxu1 %v952_v51 }
 0x17f   :  { %898 = vmatprep.subr.bf16.mxu1 %v1085_v59 }
 0x182   :  { %899 = vmatpush3.bf16.msra.mxu1 %v953_v52 }
 0x183   :  { %900 = vmatprep.subr.bf16.mxu1 %v1085_v59 }
 0x186   :  { %901 = vmatpush3.bf16.msra.mxu1 %v954_v53 }
 0x187   :  { %902 = vmatprep.subr.bf16.mxu1 %v1085_v59 }
 0x18a   :  { %903 = vmatpush3.bf16.msra.mxu1 %v955_v54 }
 0x18b   :  { %904 = vmatprep.subr.bf16.mxu1 %v1085_v59 }
 0x18e   :  { %905 = vmatpush3.bf16.msra.mxu1 %v956_v55 }
 0x18f   :  { %906 = vmatprep.subr.bf16.mxu1 %v1085_v59 }
 0x192   :  { %907 = vmatpush3.bf16.msra.mxu1 %v957_v56 }
 0x248   :  { %v848_v3 = vpop.f32.mrb[0].mxu1 }
 0x249   :  { %v849_v4 = vpop.f32.mrb[1].mxu1 }
 0x24a   :  { %v850_v5 = vadd.f32 %v849_v4, %v848_v3  ;;  %v851_v6 = vpop.f32.mrb[2].mxu1 }
 0x24b   :  { %v852_v7 = vpop.f32.mrb[3].mxu1 }
 0x24c   :  { %v853_v8 = vadd.f32 %v852_v7, %v851_v6 }
 0x24e   :  { %v426_v9 = vadd.f32 %v853_v8, %v850_v5 }
 0x250   :  { %v427_v10 = vrot.slane %v426_v9, 4 }
 0x252   :  { %v428_v11 = vadd.f32 %v427_v10, %v426_v9 }
 0x254   :  { %v429_v12 = vrot.slane %v428_v11, 2 }
 0x256   :  { %v430_v13 = vadd.f32 %v429_v12, %v428_v11 }
 0x258   :  { %v431_v14 = vrot.slane %v430_v13, 1 }
 0x25a   :  { %v432_v15 = vadd.f32 %v431_v14, %v430_v13 }
 0x25c   :  { %v433_v16 = vmul.f32 0.0625, %v432_v15 }
 0x25e   :  { %v434_v17 = vsub.f32 %v850_v5, %v433_v16  ;;  %v435_v18 = vsub.f32 %v853_v8, %v433_v16 }
 0x260   :  { %v436_v19 = vmul.f32 %v434_v17, %v434_v17  ;;  %v437_v20 = vmul.f32 %v435_v18, %v435_v18 }
 0x262   :  { %v438_v21 = vadd.f32 %v437_v20, %v436_v19 }
 0x264   :  { %v439_v22 = vrot.slane %v438_v21, 4 }
 0x266   :  { %v440_v23 = vadd.f32 %v439_v22, %v438_v21  ;;  %v484_v21 = vld [vmem:[#allocation6 + $0xb] ss:$0 sm:$0xff] }
 0x268   :  { %v441_v24 = vrot.slane %v440_v23, 2 }
 0x26a   :  { %v442_v25 = vadd.f32 %v441_v24, %v440_v23 }
 0x26c   :  { %v443_v26 = vrot.slane %v442_v25, 1 }
 0x26e   :  { %v444_v27 = vadd.f32 %v443_v26, %v442_v25 }
 0x270   :  { %v445_v28 = vmul.f32 0.0625, %v444_v27 }
 0x272   :  { %v446_v29 = vadd.f32 1e-05, %v445_v28 }
 0x274   :  { %978 = vrsqrt.f32 %v446_v29 }
 0x27e   :  { %v979_v31 = vpop.eup %978 }
 0x27f   :  { %v448_v32 = vmul.f32 %v979_v31, %v285_v30 }
 0x281   :  { %v449_v34 = vmul.f32 %v448_v32, %v434_v17  ;;  %v450_v35 = vmul.f32 %v448_v32, %v435_v18  ;;  %v483_v18 = vld [vmem:[#allocation6 + $0x3] ss:$0 sm:$0xff] }
 0x283   :  { %v451_v36 = vadd.f32 %v449_v34, %v286_v33  ;;  %v452_v37 = vadd.f32 %v450_v35, %v286_v33 }
 0x285   :  { %v810_v38 = vmul.f32 -1.442695, %v451_v36  ;;  %v811_v39 = vmul.f32 -1.442695, %v452_v37 }
 0x287   :  { %980 = vpow2.f32 %v810_v38 }
 0x288   :  { %982 = vpow2.f32 %v811_v39 }
 0x291   :  { %v981_v40 = vpop.eup %980 }
 0x292   :  { %v983_v41 = vpop.eup %982  ;;  %v459_v42 = vadd.f32 1.0, %v981_v40 }
 0x293   :  { %v460_v43 = vadd.f32 1.0, %v983_v41 }
 0x294   :  { %984 = vrcp.f32 %v459_v42 }
 0x295   :  { %986 = vrcp.f32 %v460_v43 }
 0x29e   :  { %v985_v44 = vpop.eup %984 }
 0x29f   :  { %v987_v45 = vpop.eup %986  ;;  %v465_v46 = vmul.f32 %v985_v44, %v451_v36 }
 0x2a0   :  { %v466_v47 = vmul.f32 %v987_v45, %v452_v37 }
 0x2a2   :  { %v485_v48 = vpack.c.bf16 %v466_v47, %v465_v46 }
 0x2a4   :  { %889 = vmatmul.mubr.bf16.vlgmr.msra.gmra.mrb[4].mxu0 %v485_v48 }
 0x377   :  { %v568_v57 = vpop.f32.mrb[4].mxu0 }
 0x378   :  { %v890_v58 = vpop.f32.mrb[5].mxu0 }
 0x379   :  { %v571_v60 = vpop.f32.mrb[6].mxu0 }
 0x37a   :  { %v575_v61 = vadd.f32 %v571_v60, %v568_v57  ;;  %v891_v62 = vpop.f32.mrb[7].mxu0 }
 0x37c   :  { %v576_v63 = vrot.slane %v575_v61, 4 }
 0x37e   :  { %v577_v0 = vadd.f32 %v576_v63, %v575_v61  ;;  %v632_v63 = vld [vmem:[#allocation6 + $0x4] ss:$0 sm:$0xff] }
 0x380   :  { %v578_v1 = vrot.slane %v577_v0, 2 }
 0x382   :  { %v579_v2 = vadd.f32 %v578_v1, %v577_v0 }
 0x384   :  { %v580_v3 = vrot.slane %v579_v2, 1 }
 0x386   :  { %v581_v4 = vadd.f32 %v580_v3, %v579_v2  ;;  %v633_v2 = vld [vmem:[#allocation6 + $0xc] ss:$0 sm:$0xff] }
 0x388   :  { %v582_v5 = vmul.f32 0.0625, %v581_v4 }
 0x38a   :  { %v583_v6 = vsub.f32 %v568_v57, %v582_v5  ;;  %v584_v7 = vsub.f32 %v571_v60, %v582_v5 }
 0x38c   :  { %v585_v8 = vmul.f32 %v583_v6, %v583_v6  ;;  %v586_v9 = vmul.f32 %v584_v7, %v584_v7 }
 0x38e   :  { %v587_v10 = vadd.f32 %v586_v9, %v585_v8 }
 0x390   :  { %v588_v59 = vrot.slane %v587_v10, 4 }
 0x392   :  { %v589_v11 = vadd.f32 %v588_v59, %v587_v10 }
 0x394   :  { %v590_v12 = vrot.slane %v589_v11, 2 }
 0x396   :  { %v591_v13 = vadd.f32 %v590_v12, %v589_v11 }
 0x398   :  { %v592_v14 = vrot.slane %v591_v13, 1 }
 0x39a   :  { %v593_v15 = vadd.f32 %v592_v14, %v591_v13  ;;  %v765_v13 = vld [vmem:[#allocation6 + $0x5] ss:$0 sm:$0xff] }
 0x39c   :  { %v594_v16 = vmul.f32 0.0625, %v593_v15 }
 0x39e   :  { %v595_v17 = vadd.f32 1e-05, %v594_v16 }
 0x3a0   :  { %988 = vrsqrt.f32 %v595_v17 }
 0x3aa   :  { %v989_v19 = vpop.eup %988 }
 0x3ab   :  { %v597_v20 = vmul.f32 %v989_v19, %v483_v18  ;;  %v766_v19 = vld [vmem:[#allocation6 + $0xd] ss:$0 sm:$0xff] }
 0x3ad   :  { %v598_v22 = vmul.f32 %v597_v20, %v583_v6  ;;  %v599_v23 = vmul.f32 %v597_v20, %v584_v7 }
 0x3af   :  { %v600_v24 = vadd.f32 %v598_v22, %v484_v21  ;;  %v601_v25 = vadd.f32 %v599_v23, %v484_v21 }
 0x3b1   :  { %v820_v26 = vmul.f32 -1.442695, %v600_v24  ;;  %v821_v27 = vmul.f32 -1.442695, %v601_v25 }
 0x3b3   :  { %990 = vpow2.f32 %v820_v26 }
 0x3b4   :  { %992 = vpow2.f32 %v821_v27 }
 0x3bd   :  { %v991_v28 = vpop.eup %990 }
 0x3be   :  { %v993_v29 = vpop.eup %992  ;;  %v608_v30 = vadd.f32 1.0, %v991_v28 }
 0x3bf   :  { %v609_v31 = vadd.f32 1.0, %v993_v29 }
 0x3c0   :  { %994 = vrcp.f32 %v608_v30 }
 0x3c1   :  { %996 = vrcp.f32 %v609_v31 }
 0x3ca   :  { %v995_v32 = vpop.eup %994 }
 0x3cb   :  { %v997_v33 = vpop.eup %996  ;;  %v614_v34 = vmul.f32 %v995_v32, %v600_v24 }
 0x3cc   :  { %v615_v35 = vmul.f32 %v997_v33, %v601_v25 }
 0x3ce   :  { %v634_v36 = vpack.c.bf16 %v615_v35, %v614_v34 }
 0x3d0   :  { %909 = vmatmul.mubr.bf16.vlgmr.msra.gmra.mrb[4].mxu1 %v634_v36 }
 0x4a3   :  { %v717_v37 = vpop.f32.mrb[4].mxu1 }
 0x4a4   :  { %v910_v38 = vpop.f32.mrb[5].mxu1 }
 0x4a5   :  { %v720_v39 = vpop.f32.mrb[6].mxu1 }
 0x4a6   :  { %v724_v40 = vadd.f32 %v720_v39, %v717_v37  ;;  %v911_v41 = vpop.f32.mrb[7].mxu1 }
 0x4a8   :  { %v725_v42 = vrot.slane %v724_v40, 4 }
 0x4aa   :  { %v726_v43 = vadd.f32 %v725_v42, %v724_v40 }
 0x4ac   :  { %v727_v44 = vrot.slane %v726_v43, 2 }
 0x4ae   :  { %v728_v45 = vadd.f32 %v727_v44, %v726_v43 }
 0x4b0   :  { %v729_v46 = vrot.slane %v728_v45, 1 }
 0x4b2   :  { %v730_v47 = vadd.f32 %v729_v46, %v728_v45 }
 0x4b4   :  { %v731_v48 = vmul.f32 0.0625, %v730_v47 }
 0x4b6   :  { %v732_v49 = vsub.f32 %v717_v37, %v731_v48  ;;  %v733_v50 = vsub.f32 %v720_v39, %v731_v48 }
 0x4b8   :  { %v734_v51 = vmul.f32 %v732_v49, %v732_v49  ;;  %v735_v52 = vmul.f32 %v733_v50, %v733_v50 }
 0x4ba   :  { %v736_v53 = vadd.f32 %v735_v52, %v734_v51 }
 0x4bc   :  { %v737_v54 = vrot.slane %v736_v53, 4 }
 0x4be   :  { %v738_v55 = vadd.f32 %v737_v54, %v736_v53 }
 0x4c0   :  { %v739_v56 = vrot.slane %v738_v55, 2 }
 0x4c2   :  { %v740_v57 = vadd.f32 %v739_v56, %v738_v55 }
 0x4c4   :  { %v741_v58 = vrot.slane %v740_v57, 1 }
 0x4c6   :  { %v742_v60 = vadd.f32 %v741_v58, %v740_v57 }
 0x4c8   :  { %v743_v61 = vmul.f32 0.0625, %v742_v60 }
 0x4ca   :  { %v744_v62 = vadd.f32 1e-05, %v743_v61 }
 0x4cc   :  { %998 = vrsqrt.f32 %v744_v62 }
 0x4d6   :  { %v999_v0 = vpop.eup %998 }
 0x4d7   :  { %v746_v1 = vmul.f32 %v999_v0, %v632_v63 }
 0x4d9   :  { %v748_v3 = vmul.f32 %v746_v1, %v733_v50  ;;  %v747_v4 = vmul.f32 %v746_v1, %v732_v49 }
 0x4db   :  { %v749_v5 = vadd.f32 %v747_v4, %v633_v2  ;;  %v750_v6 = vadd.f32 %v748_v3, %v633_v2 }
 0x4dd   :  { %v830_v7 = vmul.f32 -1.442695, %v749_v5  ;;  %v831_v8 = vmul.f32 -1.442695, %v750_v6 }
 0x4df   :  { %1000 = vpow2.f32 %v830_v7 }
 0x4e0   :  { %1002 = vpow2.f32 %v831_v8 }
 0x4e9   :  { %v1001_v9 = vpop.eup %1000 }
 0x4ea   :  { %v1003_v10 = vpop.eup %1002  ;;  %v757_v59 = vadd.f32 1.0, %v1001_v9 }
 0x4eb   :  { %v758_v11 = vadd.f32 1.0, %v1003_v10 }
 0x4ec   :  { %1004 = vrcp.f32 %v757_v59 }
 0x4ed   :  { %1006 = vrcp.f32 %v758_v11 }
 0x4f6   :  { %v1005_v12 = vpop.eup %1004 }
 0x4f7   :  { %v1007_v14 = vpop.eup %1006  ;;  %v763_v15 = vmul.f32 %v1005_v12, %v749_v5 }
 0x4f8   :  { %v764_v17 = vmul.f32 %v1007_v14, %v750_v6 }
 0x4f9   :  { %v767_v16 = vmul.f32 %v765_v13, %v763_v15 }
 0x4fa   :  { %v768_v18 = vmul.f32 %v765_v13, %v764_v17 }
 0x4fb   :  { %769 = vadd.xlane.f32.xlu0 %v767_v16 }
 0x4ff   :  { %771 = vadd.xlane.f32.xlu0 %v768_v18 }
 0x588   :  { %v770_v20 = vpop.xlane.xlu0 %769 }
 0x589   :  { %v773_v21 = vadd.f32 %v770_v20, %v766_v19 }
 0x58b   :  { %776 = vst.msk [vmem:[%s1177_s3] sm:$0xff] %vm775_vm3, %v773_v21 }
 0x58c   :  { %v772_v22 = vpop.xlane.xlu0 %771 }
 0x58d   :  { %v774_v23 = vadd.f32 %v772_v22, %v766_v19 }
 0x58f   :  { %777 = vst.msk [vmem:[%s1177_s3 + $0x8] sm:$0xff] %vm775_vm3, %v774_v23 }
 0x590   :  { %782 = vsyncpa [#allocation3], 1 }
 0x591   :  { %783 = vsyncpa [#allocation5], 1 }

</bundles_post_ra>
